<compile_context>
chip_gen: v5e
topology: v5e:2x2
jax: 0.10.0
libtpu: 0.0.40
codegen_flags: <defaults>
</compile_context>

<pallas_src>
import functools

import jax
import jax.numpy as jnp
from jax.experimental import pallas as pl
from jax.experimental.pallas import tpu as pltpu

LANES = 128
BF16_SUBLANES = 16


def _round_up(x, m):
    return ((x + m - 1) // m) * m


def _pad2(x, rows, cols, dtype):
    """Cast to dtype and zero-pad a 2-D array up to (rows, cols)."""
    x = x.astype(dtype)
    r, c = x.shape
    if r == rows and c == cols:
        return x
    return jnp.zeros((rows, cols), dtype).at[:r, :c].set(x)


def _item_kernel(feat_ref, w1_ref, b1_ref, w2_ref, b2_ref, w3_ref, b3_ref, out_ref):
    """fc1 -> relu -> fc2 -> relu -> fc3 for one item row tile.

    Matmul operands are bf16, accumulation is f32 (preferred_element_type),
    bias add / ReLU in f32, writeback in out_ref.dtype (bf16 by default).
    """
    h = jnp.dot(feat_ref[...], w1_ref[...], preferred_element_type=jnp.float32)
    h = jnp.maximum(h + b1_ref[...], 0.0)
    h = jnp.dot(h.astype(jnp.bfloat16), w2_ref[...],
                preferred_element_type=jnp.float32)
    h = jnp.maximum(h + b2_ref[...], 0.0)
    y = jnp.dot(h.astype(jnp.bfloat16), w3_ref[...],
                preferred_element_type=jnp.float32)
    out_ref[...] = (y + b3_ref[...]).astype(out_ref.dtype)


def cl_encoder_forward(feature, feature_users, params, *,
                       tile_rows=512, out_dtype=jnp.bfloat16):
    """ClEncoder.forward() tensor-compute, Pallas-accelerated.

    Returns (x_1, cl_loss, vgae_loss) with x_1 = fc3(concat(feature_users,
    relu(fc2(relu(fc1(feature)))))).  cl_loss / vgae_loss are placeholders.
    """
    w1, b1, w2, b2, w3, b3 = params
    num_item, f_in = feature.shape
    num_user, dim_latent = feature_users.shape
    h1 = w1.shape[1]                      # 4 * dim_latent

    bf = jnp.bfloat16

    # ---------------- user half: one tiny GEMM, plain XLA (outside the grid). ----
    if num_user > 0:
        x_users = jnp.dot(feature_users.astype(bf), w3.astype(bf),
                          preferred_element_type=jnp.float32) + b3
    else:
        x_users = jnp.zeros((0, dim_latent), jnp.float32)

    # ---------------- item half: Pallas kernel over row tiles. -------------------
    if num_item > 0:
        fin_p = _round_up(f_in, LANES)        # 128-lane K feed into fc1 MXU tiles
        h1_p = _round_up(h1, LANES)           # lane-dense hidden dim
        dl_p = _round_up(dim_latent, LANES)   # lane-dense output dim
        out_bytes = jnp.dtype(out_dtype).itemsize

        weights_bytes = ((fin_p * h1_p + h1_p * dl_p + dl_p * dl_p) * 2
                         + (h1_p + 2 * dl_p) * 4)

        # Row tile: multiple of 16 (bf16 sublane packing), sized so the
        # double-buffered streaming set + single-buffered weights stay within a
        # conservative cross-generation VMEM budget (v7x: 64 MiB physical).
        tm = min(tile_rows, _round_up(num_item, BF16_SUBLANES))
        tm = max(BF16_SUBLANES, _round_up(tm, BF16_SUBLANES))
        STREAM_BUDGET = 28 * 1024 * 1024
        while tm > BF16_SUBLANES:
            stream_bytes = 2 * tm * fin_p * 2 + 2 * tm * dl_p * out_bytes
            if weights_bytes + stream_bytes <= STREAM_BUDGET:
                break
            tm = max(BF16_SUBLANES, _round_up(tm // 2, BF16_SUBLANES))
        stream_bytes = 2 * tm * fin_p * 2 + 2 * tm * dl_p * out_bytes

        ni_pad = _round_up(num_item, tm)
        grid = (ni_pad // tm,)

        # bf16 matmul operands (weights cast once -> half the HBM traffic).
        feat_p = _pad2(feature, ni_pad, fin_p, bf)
        w1_p = _pad2(w1, fin_p, h1_p, bf)
        w2_p = _pad2(w2, h1_p, dl_p, bf)
        w3_p = _pad2(w3, dl_p, dl_p, bf)
        b1_p = _pad2(b1.reshape(1, -1), 1, h1_p, jnp.float32)
        b2_p = _pad2(b2.reshape(1, -1), 1, dl_p, jnp.float32)
        b3_p = _pad2(b3.reshape(1, -1), 1, dl_p, jnp.float32)

        # Row tiles stream (default double-buffering); weights/biases have a
        # constant block index -> single-buffered residents.
        resident = functools.partial(pl.BlockSpec, pipeline_mode=pl.Buffered(1))
        in_specs = [
            pl.BlockSpec((tm, fin_p),   lambda i: (i, 0)),
            resident((fin_p, h1_p),     lambda i: (0, 0)),
            resident((1, h1_p),         lambda i: (0, 0)),
            resident((h1_p, dl_p),      lambda i: (0, 0)),
            resident((1, dl_p),         lambda i: (0, 0)),
            resident((dl_p, dl_p),      lambda i: (0, 0)),
            resident((1, dl_p),         lambda i: (0, 0)),
        ]
        out_spec = pl.BlockSpec((tm, dl_p), lambda i: (i, 0))

        flops = (2 * ni_pad * fin_p * h1_p
                 + 2 * ni_pad * h1_p * dl_p
                 + 2 * ni_pad * dl_p * dl_p)
        bytes_accessed = (int(feat_p.size) * 2 + weights_bytes
                          + ni_pad * dl_p * out_bytes)

        # Explicit scoped-VMEM limit: working set + headroom, capped below v7x's
        # 64 MiB physical VMEM; floor at 32 MiB (above v5e's 16 MiB default).
        vmem_limit = int(min(max((weights_bytes + stream_bytes) * 2 + (8 << 20),
                                 32 << 20), 56 << 20))

        out = pl.pallas_call(
            _item_kernel,
            out_shape=jax.ShapeDtypeStruct((ni_pad, dl_p), out_dtype),
            grid_spec=pltpu.PrefetchScalarGridSpec(
                num_scalar_prefetch=0,
                grid=grid,
                in_specs=in_specs,
                out_specs=out_spec,
            ),
            compiler_params=pltpu.CompilerParams(
                dimension_semantics=("parallel",),
                vmem_limit_bytes=vmem_limit,
            ),
            cost_estimate=pl.CostEstimate(flops=int(flops), transcendentals=0,
                                          bytes_accessed=int(bytes_accessed)),
        )(feat_p, w1_p, b1_p, w2_p, b2_p, w3_p, b3_p)

        # NOTE: zero-padded item rows carry relu(b1)->fc2->fc3 garbage; sliced off
        # here — never reduce over the raw kernel output before slicing.
        x_items = out[:num_item, :dim_latent].astype(jnp.float32)
    else:
        x_items = jnp.zeros((0, dim_latent), jnp.float32)

    # Original concat order: users first, then items.
    x_1 = jnp.concatenate([x_users, x_items], axis=0)

    # TODO(synk): VGAE simulation / InfoNCE loss are host-side & use an undefined
    # external class; return placeholder losses.
    cl_loss = jnp.float32(0.0)
    vgae_loss = jnp.float32(0.0)
    return x_1, cl_loss, vgae_loss


def init_params(key, f_in, dim_latent, num_user):
    """Deterministic parameter init (xavier-normal-ish), matches module shapes."""
    k1, k2, k3, k4, k5, k6, k7 = jax.random.split(key, 7)

    def xavier(k, fan_in, fan_out):
        std = jnp.sqrt(2.0 / (fan_in + fan_out))
        return jax.random.normal(k, (fan_in, fan_out), jnp.float32) * std

    w1 = xavier(k1, f_in, 4 * dim_latent)              # fc1: (F_in, 4*dl)
    b1 = 0.01 * jax.random.normal(k5, (4 * dim_latent,), jnp.float32)
    w2 = xavier(k2, 4 * dim_latent, dim_latent)        # fc2: (4*dl, dl)
    b2 = 0.01 * jax.random.normal(k6, (dim_latent,), jnp.float32)
    w3 = xavier(k3, dim_latent, dim_latent)            # fc3: (dl, dl)
    b3 = 0.01 * jax.random.normal(k7, (dim_latent,), jnp.float32)
    # feature_users = xavier_normal((num_user, dim_latent)) created in forward()
    feature_users = xavier(k4, num_user, dim_latent)
    return (w1, b1, w2, b2, w3, b3), feature_users


def _reference(feature, feature_users, params, out_dtype=jnp.bfloat16):
    """Plain-JAX reference mirroring the kernel's dtype policy
    (bf16 matmuls, f32 acc, bf16 item-path writeback)."""
    w1, b1, w2, b2, w3, b3 = params
    bf = jnp.bfloat16
    h = jnp.dot(feature.astype(bf), w1.astype(bf),
                preferred_element_type=jnp.float32) + b1
    h = jnp.maximum(h, 0.0)
    h = jnp.dot(h.astype(bf), w2.astype(bf),
                preferred_element_type=jnp.float32) + b2
    h = jnp.maximum(h, 0.0)
    x_items = jnp.dot(h.astype(bf), w3.astype(bf),
                      preferred_element_type=jnp.float32) + b3
    x_items = x_items.astype(out_dtype).astype(jnp.float32)
    x_users = jnp.dot(feature_users.astype(bf), w3.astype(bf),
                      preferred_element_type=jnp.float32) + b3
    return jnp.concatenate([x_users, x_items], axis=0)


if __name__ == "__main__":
    # Small shapes consistent with the module's forward:
    num_item, f_in = 8, 32       # features: (num_item, F_in)
    dim_latent = 16
    num_user = 8

    key = jax.random.PRNGKey(0)
    k_feat, k_params = jax.random.split(key)
    feature = jax.random.normal(k_feat, (num_item, f_in), jnp.float32)
    params, feature_users = init_params(k_params, f_in, dim_latent, num_user)

    x_1, cl_loss, vgae_loss = cl_encoder_forward(feature, feature_users, params)
    jax.block_until_ready(x_1)

    ref = _reference(feature, feature_users, params)
    assert x_1.shape == (num_user + num_item, dim_latent)
    assert jnp.allclose(x_1, ref, atol=2e-2, rtol=2e-2), "mismatch vs reference"

    print("KERNEL_OK")
</pallas_src>

<mosaic_0001>
module attributes {stable_mosaic.version = 11 : i64} {
  func.func @_item_kernel(%arg0: i32, %arg1: memref<16x128xbf16, #tpu.memory_space<vmem>>, %arg2: memref<128x128xbf16, #tpu.memory_space<vmem>>, %arg3: memref<1x128xf32, #tpu.memory_space<vmem>>, %arg4: memref<128x128xbf16, #tpu.memory_space<vmem>>, %arg5: memref<1x128xf32, #tpu.memory_space<vmem>>, %arg6: memref<128x128xbf16, #tpu.memory_space<vmem>>, %arg7: memref<1x128xf32, #tpu.memory_space<vmem>>, %arg8: memref<16x128xbf16, #tpu.memory_space<vmem>>) attributes {dimension_semantics = [#tpu.dimension_semantics<parallel>], iteration_bounds = array<i64: 1>, scalar_prefetch = 0 : i64, scratch_operands = 0 : i64, tpu.core_type = #tpu.core_type<tc>, window_params = [{transform_indices = @transform_0, window_bounds = array<i64: 16, 128>}, {pipeline_mode = #tpu.pipeline_mode<synchronous>, transform_indices = @transform_1, window_bounds = array<i64: 128, 128>}, {pipeline_mode = #tpu.pipeline_mode<synchronous>, transform_indices = @transform_2, window_bounds = array<i64: 1, 128>}, {pipeline_mode = #tpu.pipeline_mode<synchronous>, transform_indices = @transform_3, window_bounds = array<i64: 128, 128>}, {pipeline_mode = #tpu.pipeline_mode<synchronous>, transform_indices = @transform_4, window_bounds = array<i64: 1, 128>}, {pipeline_mode = #tpu.pipeline_mode<synchronous>, transform_indices = @transform_5, window_bounds = array<i64: 128, 128>}, {pipeline_mode = #tpu.pipeline_mode<synchronous>, transform_indices = @transform_6, window_bounds = array<i64: 1, 128>}, {transform_indices = @transform_7, window_bounds = array<i64: 16, 128>}]} {
    %c0 = arith.constant 0 : index
    %c0_0 = arith.constant 0 : index
    %0 = vector.load %arg1[%c0, %c0_0] : memref<16x128xbf16, #tpu.memory_space<vmem>>, vector<16x128xbf16>
    %c0_1 = arith.constant 0 : index
    %c0_2 = arith.constant 0 : index
    %1 = vector.load %arg2[%c0_1, %c0_2] : memref<128x128xbf16, #tpu.memory_space<vmem>>, vector<128x128xbf16>
    %cst = arith.constant dense<0.000000e+00> : vector<16x128xf32>
    %2 = tpu.matmul %0, %1, %cst {dimension_numbers = #tpu.dot_dimension_numbers<[1], [0], [0], [1], [0, 0, 1, 1], [], []>} : vector<16x128xbf16>, vector<128x128xbf16>, vector<16x128xf32> -> vector<16x128xf32>
    %c0_3 = arith.constant 0 : index
    %c0_4 = arith.constant 0 : index
    %3 = vector.load %arg3[%c0_3, %c0_4] : memref<1x128xf32, #tpu.memory_space<vmem>>, vector<1x128xf32>
    %4 = vector.broadcast %3 : vector<1x128xf32> to vector<16x128xf32>
    %5 = arith.addf %2, %4 : vector<16x128xf32>
    %cst_5 = arith.constant 0.000000e+00 : f32
    %6 = vector.broadcast %cst_5 : f32 to vector<16x128xf32>
    %7 = arith.maximumf %5, %6 : vector<16x128xf32>
    %8 = arith.truncf %7 : vector<16x128xf32> to vector<16x128xbf16>
    %c0_6 = arith.constant 0 : index
    %c0_7 = arith.constant 0 : index
    %9 = vector.load %arg4[%c0_6, %c0_7] : memref<128x128xbf16, #tpu.memory_space<vmem>>, vector<128x128xbf16>
    %cst_8 = arith.constant dense<0.000000e+00> : vector<16x128xf32>
    %10 = tpu.matmul %8, %9, %cst_8 {dimension_numbers = #tpu.dot_dimension_numbers<[1], [0], [0], [1], [0, 0, 1, 1], [], []>} : vector<16x128xbf16>, vector<128x128xbf16>, vector<16x128xf32> -> vector<16x128xf32>
    %c0_9 = arith.constant 0 : index
    %c0_10 = arith.constant 0 : index
    %11 = vector.load %arg5[%c0_9, %c0_10] : memref<1x128xf32, #tpu.memory_space<vmem>>, vector<1x128xf32>
    %12 = vector.broadcast %11 : vector<1x128xf32> to vector<16x128xf32>
    %13 = arith.addf %10, %12 : vector<16x128xf32>
    %cst_11 = arith.constant 0.000000e+00 : f32
    %14 = vector.broadcast %cst_11 : f32 to vector<16x128xf32>
    %15 = arith.maximumf %13, %14 : vector<16x128xf32>
    %16 = arith.truncf %15 : vector<16x128xf32> to vector<16x128xbf16>
    %c0_12 = arith.constant 0 : index
    %c0_13 = arith.constant 0 : index
    %17 = vector.load %arg6[%c0_12, %c0_13] : memref<128x128xbf16, #tpu.memory_space<vmem>>, vector<128x128xbf16>
    %cst_14 = arith.constant dense<0.000000e+00> : vector<16x128xf32>
    %18 = tpu.matmul %16, %17, %cst_14 {dimension_numbers = #tpu.dot_dimension_numbers<[1], [0], [0], [1], [0, 0, 1, 1], [], []>} : vector<16x128xbf16>, vector<128x128xbf16>, vector<16x128xf32> -> vector<16x128xf32>
    %c0_15 = arith.constant 0 : index
    %c0_16 = arith.constant 0 : index
    %19 = vector.load %arg7[%c0_15, %c0_16] : memref<1x128xf32, #tpu.memory_space<vmem>>, vector<1x128xf32>
    %20 = vector.broadcast %19 : vector<1x128xf32> to vector<16x128xf32>
    %21 = arith.addf %18, %20 : vector<16x128xf32>
    %22 = arith.truncf %21 : vector<16x128xf32> to vector<16x128xbf16>
    %c0_17 = arith.constant 0 : index
    %c0_18 = arith.constant 0 : index
    %23 = vector.load %arg8[%c0_17, %c0_18] : memref<16x128xbf16, #tpu.memory_space<vmem>>, vector<16x128xbf16>
    tpu.vector_store %arg8[%c0_17, %c0_18], %22 {strides = array<i32>} : memref<16x128xbf16, #tpu.memory_space<vmem>>, vector<16x128xbf16>,
    return
  }
  func.func @transform_0(%arg0: i32) -> (i32, i32) {
    %c0_i32 = arith.constant 0 : i32
    %c0_i32_0 = arith.constant 0 : i32
    return %arg0, %c0_i32 : i32, i32
  }
  func.func @transform_1(%arg0: i32) -> (i32, i32) {
    %c0_i32 = arith.constant 0 : i32
    %c0_i32_0 = arith.constant 0 : i32
    %c0_i32_1 = arith.constant 0 : i32
    return %c0_i32, %c0_i32_0 : i32, i32
  }
  func.func @transform_2(%arg0: i32) -> (i32, i32) {
    %c0_i32 = arith.constant 0 : i32
    %c0_i32_0 = arith.constant 0 : i32
    %c0_i32_1 = arith.constant 0 : i32
    return %c0_i32, %c0_i32_0 : i32, i32
  }
  func.func @transform_3(%arg0: i32) -> (i32, i32) {
    %c0_i32 = arith.constant 0 : i32
    %c0_i32_0 = arith.constant 0 : i32
    %c0_i32_1 = arith.constant 0 : i32
    return %c0_i32, %c0_i32_0 : i32, i32
  }
  func.func @transform_4(%arg0: i32) -> (i32, i32) {
    %c0_i32 = arith.constant 0 : i32
    %c0_i32_0 = arith.constant 0 : i32
    %c0_i32_1 = arith.constant 0 : i32
    return %c0_i32, %c0_i32_0 : i32, i32
  }
  func.func @transform_5(%arg0: i32) -> (i32, i32) {
    %c0_i32 = arith.constant 0 : i32
    %c0_i32_0 = arith.constant 0 : i32
    %c0_i32_1 = arith.constant 0 : i32
    return %c0_i32, %c0_i32_0 : i32, i32
  }
  func.func @transform_6(%arg0: i32) -> (i32, i32) {
    %c0_i32 = arith.constant 0 : i32
    %c0_i32_0 = arith.constant 0 : i32
    %c0_i32_1 = arith.constant 0 : i32
    return %c0_i32, %c0_i32_0 : i32, i32
  }
  func.func @transform_7(%arg0: i32) -> (i32, i32) {
    %c0_i32 = arith.constant 0 : i32
    %c0_i32_0 = arith.constant 0 : i32
    return %arg0, %c0_i32 : i32, i32
  }
}

</mosaic_0001>

<bundles_post_ra>
// kernel: tpu_custom_call.1
= control target key start
LH: loop header
LB: loop body
LE: loop exit
PB: predicated region body
PF: predicated region fallthrough
CT: control target
= control target key end

     0   :  { %12 = vsyncpa [#allocation3], 0  ;;  %s729_s0 = inlined_call_operand.hbm [shape: bf16[16,128], index: 0, kind: input, shape index: {}]   ;;  %s730_s1 = inlined_call_operand.hbm [shape: bf16[128,128], index: 1, kind: input, shape index: {}]   ;;  %s731_s2 = inlined_call_operand.vmem [shape: f32[1,128], index: 2, kind: input, shape index: {}]   ;;  %s732_s3 = inlined_call_operand.hbm [shape: bf16[128,128], index: 3, kind: input, shape index: {}]   ;;  %s733_s4 = inlined_call_operand.vmem [shape: f32[1,128], index: 4, kind: input, shape index: {}]   ;;  %s734_s5 = inlined_call_operand.hbm [shape: bf16[128,128], index: 5, kind: input, shape index: {}]   ;;  %s735_s6 = inlined_call_operand.vmem [shape: f32[1,128], index: 6, kind: input, shape index: {}]   ;;  %s736_s7 = inlined_call_operand.hbm [shape: bf16[16,128], index: 7, kind: output, shape index: {}]  }
   0x1   :  { %13 = vsyncpa [#allocation6], 0 }
   0x2   :  { %14 = vsyncpa [#allocation9], 0 }
   0x3   :  { %15 = vsyncpa [#allocation4], 0  ;;  %s33_s26 = sshll.u32 %s730_s1, 4  ;;  %s643_s27 = smov [#allocation5]   ;;  %s34_s26 = int_to_ptr.hbm [resolvable:$true] %s33_s26 }
   0x4   :  { %s35_s28 = sshll.u32 %s643_s27, 4  ;;  %s20_s8 = sshll.u32 %s729_s0, 4  ;;  %s36_s28 = int_to_ptr.vmem [resolvable:$true] %s35_s28  ;;  %s21_s8 = int_to_ptr.hbm [resolvable:$true] %s20_s8 }
   0x5   :  { %s644_s9 = smov 64   ;;  %s645_s10 = smov 4  }
   0x6   :  { %41 = dma.hbm_to_vmem [thread:$0]  %s34_s26, 1024, %s36_s28, [#allocation6], %s644_s9, %s644_s9, %s645_s10  }
   0x7   :  { %s646_s11 = smov [#allocation2]   ;;  %s48_s1 = sshll.u32 %s732_s3, 4  ;;  %s49_s1 = int_to_ptr.hbm [resolvable:$true] %s48_s1 }
   0x8   :  { %s22_s12 = sshll.u32 %s646_s11, 4  ;;  %s63_s16 = sshll.u32 %s734_s5, 4  ;;  %s23_s12 = int_to_ptr.vmem [resolvable:$true] %s22_s12  ;;  %s64_s16 = int_to_ptr.hbm [resolvable:$true] %s63_s16 }
   0x9   :  { %28 = dma.hbm_to_vmem [thread:$0]  %s21_s8, 128, %s23_s12, [#allocation3], %s644_s9, %s644_s9, %s645_s10  }
   0xa   :  { %s647_s17 = smov [#allocation7]   ;;  %s648_s19 = smov [#allocation8]  }
   0xb   :  { %s50_s18 = sshll.u32 %s647_s17, 4  ;;  %s65_s3 = sshll.u32 %s648_s19, 4  ;;  %s51_s18 = int_to_ptr.vmem [resolvable:$true] %s50_s18  ;;  %s66_s3 = int_to_ptr.vmem [resolvable:$true] %s65_s3 }
   0xc   :  { %56 = dma.hbm_to_vmem [thread:$0]  %s49_s1, 1024, %s51_s18, [#allocation6], %s644_s9, %s644_s9, %s645_s10  }
   0xd   :  { %71 = dma.hbm_to_vmem [thread:$0]  %s64_s16, 1024, %s66_s3, [#allocation9], %s644_s9, %s644_s9, %s645_s10  }
   0xe   :  { %635 = dma.done.wait [#allocation3], 128  }
   0xf   :  { %636 = vsyncadd [#allocation3], 4294967168 }
  0x10   :  { %637 = dma.done.wait [#allocation6], 2048  }
  0x11   :  { %638 = vsyncadd [#allocation6], 4294965248 }
  0x12   :  { %639 = dma.done.wait [#allocation9], 1024  }
  0x13   :  { %640 = vsyncadd [#allocation9], 4294966272  ;;  %v483_v0 = vld [vmem:[#allocation5 + $0x38] sm:$0xff]  ;;  %v482_v1 = vld [vmem:[#allocation5 + $0x30] sm:$0xff]  ;;  %s649_s24 = smov [#allocation10]   ;;  %s360_s28 = sshll.u32 %s736_s7, 4  ;;  %s361_s28 = int_to_ptr.hbm [resolvable:$true] %s360_s28 }
  0x14   :  { %166 = vmatpush.bf16.msra.mxu0 %v483_v0  ;;  %v491_v2 = vld [vmem:[#allocation7 + $0x38] sm:$0xff]  ;;  %v490_v3 = vld [vmem:[#allocation7 + $0x30] sm:$0xff]  ;;  %v481_v4 = vld [vmem:[#allocation5 + $0x28] sm:$0xff]  ;;  %s358_s25 = sshll.u32 %s649_s24, 4  ;;  %s359_s25 = int_to_ptr.vmem [resolvable:$true] %s358_s25 }
  0x15   :  { %251 = vmatpush.bf16.msra.mxu1 %v491_v2  ;;  %v489_v5 = vld [vmem:[#allocation7 + $0x28] sm:$0xff]  ;;  %v480_v6 = vld [vmem:[#allocation5 + $0x20] sm:$0xff]  ;;  %v479_v8 = vld [vmem:[#allocation5 + $0x18] sm:$0xff] }
  0x16   :  { %v488_v7 = vld [vmem:[#allocation7 + $0x20] sm:$0xff]  ;;  %v478_v9 = vld [vmem:[#allocation5 + $0x10] sm:$0xff]  ;;  %v477_v10 = vld [vmem:[#allocation5 + $0x8] sm:$0xff] }
  0x17   :  { %v476_v11 = vld [vmem:[#allocation5] sm:$0xff]  ;;  %v475_v12 = vld [vmem:[#allocation2] sm:$0xff]  ;;  %v486_v14 = vld [vmem:[#allocation7 + $0x10] sm:$0xff] }
  0x18   :  { %167 = vmatpush.bf16.msra.mxu0 %v482_v1  ;;  %v487_v13 = vld [vmem:[#allocation7 + $0x18] sm:$0xff]  ;;  %v485_v15 = vld [vmem:[#allocation7 + $0x8] sm:$0xff]  ;;  %v484_v16 = vld [vmem:[#allocation7] sm:$0xff] }
  0x19   :  { %252 = vmatpush.bf16.msra.mxu1 %v490_v3  ;;  %v499_v17 = vld [vmem:[#allocation8 + $0x38] sm:$0xff]  ;;  %v498_v18 = vld [vmem:[#allocation8 + $0x30] sm:$0xff]  ;;  %v497_v19 = vld [vmem:[#allocation8 + $0x28] sm:$0xff] }
  0x1a   :  { %336 = vmatpush.bf16.msra.mxu2 %v499_v17  ;;  %v496_v20 = vld [vmem:[#allocation8 + $0x20] sm:$0xff]  ;;  %v512_v22 = vld [vmem:[%s731_s2] ss:$0 sm:$0xff]  ;;  %v494_v30 = vld [vmem:[#allocation8 + $0x10] sm:$0xff] }
  0x1b   :  { %v495_v29 = vld [vmem:[#allocation8 + $0x18] sm:$0xff]  ;;  %v493_v31 = vld [vmem:[#allocation8 + $0x8] sm:$0xff]  ;;  %v492_v32 = vld [vmem:[#allocation8] sm:$0xff] }
  0x1c   :  { %168 = vmatpush.bf16.msra.mxu0 %v481_v4  ;;  %v513_v34 = vld [vmem:[%s733_s4] ss:$0 sm:$0xff] }
  0x1d   :  { %253 = vmatpush.bf16.msra.mxu1 %v489_v5  ;;  %v514_v42 = vld [vmem:[%s735_s6] ss:$0 sm:$0xff] }
  0x1e   :  { %337 = vmatpush.bf16.msra.mxu2 %v498_v18 }
  0x20   :  { %169 = vmatpush.bf16.msra.mxu0 %v480_v6 }
  0x21   :  { %254 = vmatpush.bf16.msra.mxu1 %v488_v7 }
  0x22   :  { %338 = vmatpush.bf16.msra.mxu2 %v497_v19 }
  0x24   :  { %170 = vmatpush.bf16.msra.mxu0 %v479_v8 }
  0x25   :  { %255 = vmatpush.bf16.msra.mxu1 %v487_v13 }
  0x26   :  { %339 = vmatpush.bf16.msra.mxu2 %v496_v20 }
  0x28   :  { %171 = vmatpush.bf16.msra.mxu0 %v478_v9 }
  0x29   :  { %256 = vmatpush.bf16.msra.mxu1 %v486_v14 }
  0x2a   :  { %340 = vmatpush.bf16.msra.mxu2 %v495_v29 }
  0x2c   :  { %172 = vmatpush.bf16.msra.mxu0 %v477_v10 }
  0x2d   :  { %257 = vmatpush.bf16.msra.mxu1 %v485_v15 }
  0x2e   :  { %341 = vmatpush.bf16.msra.mxu2 %v494_v30 }
  0x30   :  { %173 = vmatpush.bf16.msra.mxu0 %v476_v11 }
  0x31   :  { %258 = vmatpush.bf16.msra.mxu1 %v484_v16 }
  0x32   :  { %342 = vmatpush.bf16.msra.mxu2 %v493_v31 }
  0x33   :  { %174 = vmatmul.bf16.vlgmr.msra.gmra.mxu0 %v475_v12 }
  0x36   :  { %343 = vmatpush.bf16.msra.mxu2 %v492_v32 }
  0xb0   :  { %v175_v21 = vpop.f32.mrf.mxu0 }
  0xb1   :  { %v176_v23 = vadd.f32 %v512_v22, %v175_v21 }
  0xb3   :  { %v180_v26 = vmax.f32 %v176_v23, 0.0 }
  0xb8   :  { %v177_v24 = vpop.f32.mrf.mxu0 }
  0xb9   :  { %v178_v25 = vadd.f32 %v512_v22, %v177_v24 }
  0xbb   :  { %v181_v27 = vmax.f32 %v178_v25, 0.0 }
  0xbd   :  { %v182_v28 = vpack.c.bf16 %v181_v27, %v180_v26 }
  0xbf   :  { %259 = vmatmul.bf16.vlgmr.msra.gmra.mxu1 %v182_v28 }
 0x13c   :  { %v260_v33 = vpop.f32.mrf.mxu1 }
 0x13d   :  { %v261_v35 = vadd.f32 %v513_v34, %v260_v33 }
 0x13f   :  { %v265_v38 = vmax.f32 %v261_v35, 0.0 }
 0x144   :  { %v262_v36 = vpop.f32.mrf.mxu1 }
 0x145   :  { %v263_v37 = vadd.f32 %v513_v34, %v262_v36 }
 0x147   :  { %v266_v39 = vmax.f32 %v263_v37, 0.0 }
 0x149   :  { %v267_v40 = vpack.c.bf16 %v266_v39, %v265_v38 }
 0x14b   :  { %344 = vmatmul.bf16.vlgmr.msra.gmra.mxu2 %v267_v40 }
 0x1ce   :  { %v345_v41 = vpop.f32.mrf.mxu2 }
 0x1cf   :  { %v346_v44 = vadd.f32 %v514_v42, %v345_v41 }
 0x1d6   :  { %v347_v43 = vpop.f32.mrf.mxu2 }
 0x1d7   :  { %v348_v45 = vadd.f32 %v514_v42, %v347_v43 }
 0x1d9   :  { %v503_v46 = vpack.c.bf16 %v348_v45, %v346_v44 }
 0x1db   :  { %504 = vst [vmem:[#allocation10] sm:$0xff] %v503_v46  }
 0x1dc   :  { %366 = dma.vmem_to_hbm [thread:$0]  %s359_s25, 128, %s361_s28, [#allocation4], %s644_s9, %s644_s9, %s645_s10  }
 0x1dd   :  { %641 = dma.done.wait [#allocation4], 128  }
 0x1de   :  { %642 = vsyncadd [#allocation4], 4294967168 }
 0x1df   :  { %371 = vsyncpa [#allocation3], 1 }
 0x1e0   :  { %372 = vsyncpa [#allocation6], 1 }
 0x1e1   :  { %373 = vsyncpa [#allocation9], 1 }
 0x1e2   :  { %374 = vsyncpa [#allocation4], 1 }

</bundles_post_ra>
